<compile_context>
chip_gen: v7x
topology: tpu7x:2x2x1
jax: 0.10.0
libtpu: 0.0.40
codegen_flags: <defaults>
</compile_context>

<pallas_src>
import functools
from collections import namedtuple

import jax
import jax.numpy as jnp
from jax.experimental import pallas as pl
from jax.experimental.pallas import tpu as pltpu

NEG_INF = -1e30  # padding bias for padded class columns (kills them in log_softmax)

BaseStreamOut = namedtuple("BaseStreamOut", ["out", "t_length", "encoder_out"])
EncoderOut = namedtuple("EncoderOut", ["out", "t_length"])
DecoderOut = namedtuple("DecoderOut", ["out", "t_length"])


def _round_up(x, m):
    return ((x + m - 1) // m) * m


def _cdiv(a, b):
    return (a + b - 1) // b


# ----------------------------- fused kernel -----------------------------
def _fused_kernel(x_ref, we_ref, be_ref, wd_ref, bd_ref, enc_ref, dec_ref):
    """One time-tile of the fused encoder+decoder.

    x_ref:   [N, C, bt, HW] f32   (h*w on the 128-lane axis -> full-width lane reduce)
    we_ref:  [C,  Dp] bf16        be_ref: [1, Dp] f32  (cols >= D are 0)
    wd_ref:  [Dp, Kp] bf16        bd_ref: [1, Kp] f32  (cols >= K are -1e30)
    enc_ref: [N, bt, Dp] f32      (lane-dense, Dp 128-padded)
    dec_ref: [N, bt, Kp] f32      (lane-dense, Kp 128-padded)
    """
    n = x_ref.shape[0]

    # global spatial mean-pool: lane reduction over HW, vectorized over (N, C, bt)
    pooled = jnp.mean(x_ref[...], axis=-1)                              # [N, C, bt] f32

    # small batched relayout (C x bt per batch) so the MXU sees M = bt rows per batch;
    # N is folded into the batch dim of a single dot_general (no per-n Python unroll).
    pooled_t = jnp.transpose(pooled, (0, 2, 1)).astype(jnp.bfloat16)    # [N, bt, C]

    # encoder: one batched MXU matmul + bias + ReLU (f32 accumulation)
    we_b = jnp.broadcast_to(we_ref[...][None], (n,) + we_ref.shape)     # [N, C, Dp] (tiny)
    h = jnp.einsum("ntc,ncd->ntd", pooled_t, we_b,
                   preferred_element_type=jnp.float32)                  # [N, bt, Dp]
    h = jnp.maximum(h + be_ref[...][None], 0.0)
    enc_ref[...] = h                                                    # full-width vst

    # decoder: one batched MXU matmul + vectorized log_softmax (f32)
    wd_b = jnp.broadcast_to(wd_ref[...][None], (n,) + wd_ref.shape)     # [N, Dp, Kp] (tiny)
    logits = jnp.einsum("ntd,ndk->ntk", h.astype(jnp.bfloat16), wd_b,
                        preferred_element_type=jnp.float32)             # [N, bt, Kp]
    logits = logits + bd_ref[...][None]
    m = jnp.max(logits, axis=-1, keepdims=True)
    p = jnp.exp(logits - m)
    lse = jnp.log(jnp.sum(p, axis=-1, keepdims=True)) + m
    dec_ref[...] = logits - lse                                         # padded cols ~ -1e30


# ----------------------------- tile sizing -----------------------------
def _pick_time_tile(n, c, hw, dp, kp, t, *, max_block_t=1024, force_block_t=None):
    """Pick the largest time tile (multiple of 8) that fits a per-generation VMEM
    budget, capped so the grid keeps >= 2 steps (>= 4 when t is large) so both v7x
    TensorCores get work and the x DMA overlaps compute.  Also returns the scoped
    VMEM limit to request (v5e defaults to only 16 MiB)."""
    t8 = _round_up(max(t, 1), 8)
    try:
        vmem_phys = int(pltpu.get_tpu_info().vmem_capacity_bytes)  # per-TC physical VMEM
    except Exception:
        vmem_phys = 64 << 20                                       # v7x = smallest current gen
    budget = vmem_phys // 2   # headroom for weights, regalloc spills, compiler scratch

    # bytes per time-row in VMEM: double-buffered x tile + double-buffered outputs
    # + estimate of live f32/bf16 intermediates (pooled / h / logits / exp).
    row_bytes = (2 * n * c * hw * 4
                 + 2 * n * (dp + kp) * 4
                 + n * (8 * c + 12 * dp + 16 * kp))
    rows_fit = max(8, min(max_block_t, (budget // max(row_bytes, 1)) // 8 * 8))

    if force_block_t is not None:
        block_t = min(_round_up(max(force_block_t, 8), 8), t8)
    else:
        min_steps = 4 if t8 >= 4 * 256 else 2
        steps = max(min_steps, _cdiv(t8, rows_fit))
        block_t = max(8, min(rows_fit, _round_up(_cdiv(t8, steps), 8)))
        block_t = min(block_t, t8)
    t_pad = _round_up(t, block_t)

    weight_bytes = (c * dp + dp * kp) * 2 + (dp + kp) * 4
    vmem_limit = max(row_bytes * block_t + 4 * weight_bytes + (2 << 20), 32 << 20)
    vmem_limit = min(vmem_limit, int(vmem_phys * 0.9))
    return block_t, t_pad, int(vmem_limit)


# ----------------------------- forward wrapper -----------------------------
def base_stream_forward(params, x, t_length, *, d_model, n_class, block_t=None):
    """x: [n, c, t, h, w] (NCTHW, as in the PyTorch module)."""
    n, c, t, h, w = x.shape
    hw = h * w
    dp = params["w_enc"].shape[1]
    kp = params["w_dec"].shape[1]

    block_t, t_pad, vmem_limit = _pick_time_tile(n, c, hw, dp, kp, t,
                                                 force_block_t=block_t)

    x4 = x.reshape(n, c, t, hw)  # pure reshape, no data movement; hw on lanes
    if t_pad != t:
        x4 = jnp.pad(x4, ((0, 0), (0, 0), (0, t_pad - t), (0, 0)))

    grid = (t_pad // block_t,)
    enc_pad, dec_pad = pl.pallas_call(
        _fused_kernel,
        out_shape=(
            jax.ShapeDtypeStruct((n, t_pad, dp), jnp.float32),
            jax.ShapeDtypeStruct((n, t_pad, kp), jnp.float32),
        ),
        grid=grid,
        in_specs=[
            pl.BlockSpec((n, c, block_t, hw), lambda j: (0, 0, j, 0)),
            pl.BlockSpec((c, dp), lambda j: (0, 0)),
            pl.BlockSpec((1, dp), lambda j: (0, 0)),
            pl.BlockSpec((dp, kp), lambda j: (0, 0)),
            pl.BlockSpec((1, kp), lambda j: (0, 0)),
        ],
        out_specs=(
            pl.BlockSpec((n, block_t, dp), lambda j: (0, j, 0)),
            pl.BlockSpec((n, block_t, kp), lambda j: (0, j, 0)),
        ),
        compiler_params=pltpu.CompilerParams(
            dimension_semantics=("parallel",),
            vmem_limit_bytes=vmem_limit),
    )(x4, params["w_enc"], params["b_enc"], params["w_dec"], params["b_dec"])

    # ---- tiny output-side rearranges (de-pad, slice away 128-padding, then permute) ----
    # These act on the D/K-sliced tensors (a few % of x's HBM traffic); with n=2 an
    # in-kernel [t, n, Kp] out_spec would sublane-pad (2 -> 8) the writeback 4x instead.
    enc_ntd = enc_pad[:, :t, :d_model]                 # [n, t, D]
    enc_out = jnp.transpose(enc_ntd, (0, 2, 1))        # [n, D, t]  (encoder 'n c t' layout)
    encoder_out = EncoderOut(out=enc_out, t_length=t_length)

    # ---- neck: None ----

    dec_ntk = dec_pad[:, :t, :n_class]                 # [n, t, K]
    dec_out = jnp.transpose(dec_ntk, (1, 0, 2))        # [t, n, K]  (the module's Rearrange)
    decoder_out = DecoderOut(out=dec_out, t_length=encoder_out.t_length)

    return BaseStreamOut(out=decoder_out.out,
                         t_length=decoder_out.t_length,
                         encoder_out=encoder_out)


# ----------------------------- params -----------------------------
def init_raw_params(key, c_in, d_model, n_class):
    kwe, kbe, kwd, kbd = jax.random.split(key, 4)
    return {
        "w_enc": jax.random.normal(kwe, (c_in, d_model), jnp.float32) * 0.1,
        "b_enc": jax.random.normal(kbe, (1, d_model), jnp.float32) * 0.1,
        "w_dec": jax.random.normal(kwd, (d_model, n_class), jnp.float32) * 0.1,
        "b_dec": jax.random.normal(kbd, (1, n_class), jnp.float32) * 0.1,
    }


def pack_params(raw):
    c_in, d = raw["w_enc"].shape
    k = raw["w_dec"].shape[1]
    dp, kp = _round_up(d, 128), _round_up(k, 128)
    w_enc = jnp.zeros((c_in, dp), jnp.bfloat16).at[:, :d].set(raw["w_enc"].astype(jnp.bfloat16))
    b_enc = jnp.zeros((1, dp), jnp.float32).at[:, :d].set(raw["b_enc"])
    w_dec = jnp.zeros((dp, kp), jnp.bfloat16).at[:d, :k].set(raw["w_dec"].astype(jnp.bfloat16))
    b_dec = jnp.full((1, kp), NEG_INF, jnp.float32).at[:, :k].set(raw["b_dec"])
    return {"w_enc": w_enc, "b_enc": b_enc, "w_dec": w_dec, "b_dec": b_dec}


# ----------------------------- pure-JAX reference -----------------------------
def reference_forward(raw, x):
    n, c, t, h, w = x.shape
    pooled = jnp.mean(x.reshape(n, c, t, h * w), axis=-1)              # [n, c, t]
    pooled = jnp.transpose(pooled, (0, 2, 1)).astype(jnp.bfloat16)     # [n, t, c]
    hh = jnp.einsum("ntc,cd->ntd", pooled, raw["w_enc"].astype(jnp.bfloat16),
                    preferred_element_type=jnp.float32) + raw["b_enc"]
    hh = jnp.maximum(hh, 0.0)
    enc_out = jnp.transpose(hh, (0, 2, 1))                             # [n, D, t]
    logits = jnp.einsum("ntd,dk->ntk", hh.astype(jnp.bfloat16),
                        raw["w_dec"].astype(jnp.bfloat16),
                        preferred_element_type=jnp.float32) + raw["b_dec"]
    logp = jax.nn.log_softmax(logits, axis=-1)
    return jnp.transpose(logp, (1, 0, 2)), enc_out                     # [t, n, K], [n, D, t]


# ----------------------------- main -----------------------------
if __name__ == "__main__":
    N, C, T, H, W = 2, 4, 16, 16, 16
    D, K = 32, 16

    key = jax.random.PRNGKey(0)
    k_x, k_p = jax.random.split(key)

    x = jax.random.normal(k_x, (N, C, T, H, W), dtype=jnp.float32)
    t_length = jnp.full((N,), T, dtype=jnp.int32)

    raw = init_raw_params(k_p, C, D, K)
    params = pack_params(raw)

    fwd = jax.jit(functools.partial(base_stream_forward, d_model=D, n_class=K))
    out = fwd(params, x, t_length)
    jax.block_until_ready(out.out)
    jax.block_until_ready(out.encoder_out.out)

    assert out.out.shape == (T, N, K)
    assert out.encoder_out.out.shape == (N, D, T)
    assert out.t_length.shape == (N,)
    assert jnp.all(jnp.isfinite(out.out))
    # log_softmax sanity: rows sum to 1 in prob space
    assert jnp.allclose(jnp.sum(jnp.exp(out.out), axis=-1), 1.0, atol=1e-4)

    # numerical check vs. pure-JAX reference (same bf16 matmul casts)
    ref_dec, ref_enc = reference_forward(raw, x)
    assert jnp.allclose(out.out, ref_dec, atol=2e-2, rtol=2e-2)
    assert jnp.allclose(out.encoder_out.out, ref_enc, atol=2e-2, rtol=2e-2)

    # TODO(synk): BaseStream is a composition wrapper; the real injected encoder/decoder
    # (e.g. a CNN backbone / BiLSTM head) would need their own kernels.
    print("KERNEL_OK")
</pallas_src>

<mosaic_0001>
module attributes {stable_mosaic.version = 11 : i64} {
  func.func @_fused_kernel(%arg0: i32, %arg1: memref<2x4x8x256xf32, #tpu.memory_space<vmem>>, %arg2: memref<4x128xbf16, #tpu.memory_space<vmem>>, %arg3: memref<1x128xf32, #tpu.memory_space<vmem>>, %arg4: memref<128x128xbf16, #tpu.memory_space<vmem>>, %arg5: memref<1x128xf32, #tpu.memory_space<vmem>>, %arg6: memref<2x8x128xf32, #tpu.memory_space<vmem>>, %arg7: memref<2x8x128xf32, #tpu.memory_space<vmem>>) attributes {dimension_semantics = [#tpu.dimension_semantics<parallel>], iteration_bounds = array<i64: 2>, scalar_prefetch = 0 : i64, scratch_operands = 0 : i64, tpu.core_type = #tpu.core_type<tc>, window_params = [{transform_indices = @transform_0, window_bounds = array<i64: 2, 4, 8, 256>}, {pipeline_mode = #tpu.pipeline_mode<synchronous>, transform_indices = @transform_1, window_bounds = array<i64: 4, 128>}, {pipeline_mode = #tpu.pipeline_mode<synchronous>, transform_indices = @transform_2, window_bounds = array<i64: 1, 128>}, {pipeline_mode = #tpu.pipeline_mode<synchronous>, transform_indices = @transform_3, window_bounds = array<i64: 128, 128>}, {pipeline_mode = #tpu.pipeline_mode<synchronous>, transform_indices = @transform_4, window_bounds = array<i64: 1, 128>}, {transform_indices = @transform_5, window_bounds = array<i64: 2, 8, 128>}, {transform_indices = @transform_6, window_bounds = array<i64: 2, 8, 128>}]} {
    %c0 = arith.constant 0 : index
    %c0_0 = arith.constant 0 : index
    %c0_1 = arith.constant 0 : index
    %c0_2 = arith.constant 0 : index
    %0 = vector.load %arg1[%c0, %c0_0, %c0_1, %c0_2] : memref<2x4x8x256xf32, #tpu.memory_space<vmem>>, vector<2x4x8x256xf32>
    %cst = arith.constant dense<0.000000e+00> : vector<2x4x8xf32>
    %1 = vector.multi_reduction <add>, %0, %cst [3] : vector<2x4x8x256xf32> to vector<2x4x8xf32>
    %cst_3 = arith.constant 2.560000e+02 : f32
    %2 = vector.broadcast %cst_3 : f32 to vector<2x4x8xf32>
    %3 = arith.divf %1, %2 : vector<2x4x8xf32>
    %4 = tpu.transpose %3, [0, 2, 1] : vector<2x4x8xf32> -> vector<2x8x4xf32>
    %5 = arith.truncf %4 : vector<2x8x4xf32> to vector<2x8x4xbf16>
    %c0_4 = arith.constant 0 : index
    %c0_5 = arith.constant 0 : index
    %6 = vector.load %arg2[%c0_4, %c0_5] : memref<4x128xbf16, #tpu.memory_space<vmem>>, vector<4x128xbf16>
    %7 = vector.shape_cast %6 : vector<4x128xbf16> to vector<1x4x128xbf16>
    %8 = vector.shape_cast %7 : vector<1x4x128xbf16> to vector<1x4x128xbf16>
    %9 = vector.broadcast %8 : vector<1x4x128xbf16> to vector<2x4x128xbf16>
    "tpu.trace_start"() <{level = 10 : i32, message = "ntc,ncd->ntd"}> : () -> ()
    %cst_6 = arith.constant dense<0.000000e+00> : vector<2x8x128xf32>
    %10 = tpu.matmul %5, %9, %cst_6 {dimension_numbers = #tpu.dot_dimension_numbers<[2], [1], [1], [2], [0, 0, 0, 1, 1, 2], [0], [0]>} : vector<2x8x4xbf16>, vector<2x4x128xbf16>, vector<2x8x128xf32> -> vector<2x8x128xf32>
    "tpu.trace_stop"() : () -> ()
    %c0_7 = arith.constant 0 : index
    %c0_8 = arith.constant 0 : index
    %11 = vector.load %arg3[%c0_7, %c0_8] : memref<1x128xf32, #tpu.memory_space<vmem>>, vector<1x128xf32>
    %12 = vector.shape_cast %11 : vector<1x128xf32> to vector<1x1x128xf32>
    %13 = vector.broadcast %12 : vector<1x1x128xf32> to vector<2x8x128xf32>
    %14 = arith.addf %10, %13 : vector<2x8x128xf32>
    %cst_9 = arith.constant 0.000000e+00 : f32
    %15 = vector.broadcast %cst_9 : f32 to vector<2x8x128xf32>
    %16 = arith.maximumf %14, %15 : vector<2x8x128xf32>
    %c0_10 = arith.constant 0 : index
    %c0_11 = arith.constant 0 : index
    %c0_12 = arith.constant 0 : index
    %17 = vector.load %arg6[%c0_10, %c0_11, %c0_12] : memref<2x8x128xf32, #tpu.memory_space<vmem>>, vector<2x8x128xf32>
    tpu.vector_store %arg6[%c0_10, %c0_11, %c0_12], %16 {strides = array<i32>} : memref<2x8x128xf32, #tpu.memory_space<vmem>>, vector<2x8x128xf32>,
    %c0_13 = arith.constant 0 : index
    %c0_14 = arith.constant 0 : index
    %18 = vector.load %arg4[%c0_13, %c0_14] : memref<128x128xbf16, #tpu.memory_space<vmem>>, vector<128x128xbf16>
    %19 = vector.shape_cast %18 : vector<128x128xbf16> to vector<1x128x128xbf16>
    %20 = vector.shape_cast %19 : vector<1x128x128xbf16> to vector<1x128x128xbf16>
    %21 = vector.broadcast %20 : vector<1x128x128xbf16> to vector<2x128x128xbf16>
    %22 = arith.truncf %16 : vector<2x8x128xf32> to vector<2x8x128xbf16>
    "tpu.trace_start"() <{level = 10 : i32, message = "ntd,ndk->ntk"}> : () -> ()
    %cst_15 = arith.constant dense<0.000000e+00> : vector<2x8x128xf32>
    %23 = tpu.matmul %22, %21, %cst_15 {dimension_numbers = #tpu.dot_dimension_numbers<[2], [1], [1], [2], [0, 0, 0, 1, 1, 2], [0], [0]>} : vector<2x8x128xbf16>, vector<2x128x128xbf16>, vector<2x8x128xf32> -> vector<2x8x128xf32>
    "tpu.trace_stop"() : () -> ()
    %c0_16 = arith.constant 0 : index
    %c0_17 = arith.constant 0 : index
    %24 = vector.load %arg5[%c0_16, %c0_17] : memref<1x128xf32, #tpu.memory_space<vmem>>, vector<1x128xf32>
    %25 = vector.shape_cast %24 : vector<1x128xf32> to vector<1x1x128xf32>
    %26 = vector.broadcast %25 : vector<1x1x128xf32> to vector<2x8x128xf32>
    %27 = arith.addf %23, %26 : vector<2x8x128xf32>
    %cst_18 = arith.constant dense<0xFF800000> : vector<2x8xf32>
    %28 = vector.multi_reduction <maximumf>, %27, %cst_18 [2] : vector<2x8x128xf32> to vector<2x8xf32>
    %29 = vector.shape_cast %28 : vector<2x8xf32> to vector<2x8x1xf32>
    %30 = vector.broadcast %29 : vector<2x8x1xf32> to vector<2x8x128xf32>
    %31 = arith.subf %27, %30 : vector<2x8x128xf32>
    %32 = math.exp %31 : vector<2x8x128xf32>
    %cst_19 = arith.constant dense<0.000000e+00> : vector<2x8xf32>
    %33 = vector.multi_reduction <add>, %32, %cst_19 [2] : vector<2x8x128xf32> to vector<2x8xf32>
    %34 = vector.shape_cast %33 : vector<2x8xf32> to vector<2x8x1xf32>
    %35 = math.log %34 : vector<2x8x1xf32>
    %36 = arith.addf %35, %29 : vector<2x8x1xf32>
    %37 = vector.broadcast %36 : vector<2x8x1xf32> to vector<2x8x128xf32>
    %38 = arith.subf %27, %37 : vector<2x8x128xf32>
    %c0_20 = arith.constant 0 : index
    %c0_21 = arith.constant 0 : index
    %c0_22 = arith.constant 0 : index
    %39 = vector.load %arg7[%c0_20, %c0_21, %c0_22] : memref<2x8x128xf32, #tpu.memory_space<vmem>>, vector<2x8x128xf32>
    tpu.vector_store %arg7[%c0_20, %c0_21, %c0_22], %38 {strides = array<i32>} : memref<2x8x128xf32, #tpu.memory_space<vmem>>, vector<2x8x128xf32>,
    return
  }
  func.func @transform_0(%arg0: i32) -> (i32, i32, i32, i32) {
    %c0_i32 = arith.constant 0 : i32
    %c0_i32_0 = arith.constant 0 : i32
    %c0_i32_1 = arith.constant 0 : i32
    %c0_i32_2 = arith.constant 0 : i32
    return %c0_i32, %c0_i32_0, %arg0, %c0_i32_1 : i32, i32, i32, i32
  }
  func.func @transform_1(%arg0: i32) -> (i32, i32) {
    %c0_i32 = arith.constant 0 : i32
    %c0_i32_0 = arith.constant 0 : i32
    %c0_i32_1 = arith.constant 0 : i32
    return %c0_i32, %c0_i32_0 : i32, i32
  }
  func.func @transform_2(%arg0: i32) -> (i32, i32) {
    %c0_i32 = arith.constant 0 : i32
    %c0_i32_0 = arith.constant 0 : i32
    %c0_i32_1 = arith.constant 0 : i32
    return %c0_i32, %c0_i32_0 : i32, i32
  }
  func.func @transform_3(%arg0: i32) -> (i32, i32) {
    %c0_i32 = arith.constant 0 : i32
    %c0_i32_0 = arith.constant 0 : i32
    %c0_i32_1 = arith.constant 0 : i32
    return %c0_i32, %c0_i32_0 : i32, i32
  }
  func.func @transform_4(%arg0: i32) -> (i32, i32) {
    %c0_i32 = arith.constant 0 : i32
    %c0_i32_0 = arith.constant 0 : i32
    %c0_i32_1 = arith.constant 0 : i32
    return %c0_i32, %c0_i32_0 : i32, i32
  }
  func.func @transform_5(%arg0: i32) -> (i32, i32, i32) {
    %c0_i32 = arith.constant 0 : i32
    %c0_i32_0 = arith.constant 0 : i32
    %c0_i32_1 = arith.constant 0 : i32
    return %c0_i32, %arg0, %c0_i32_0 : i32, i32, i32
  }
  func.func @transform_6(%arg0: i32) -> (i32, i32, i32) {
    %c0_i32 = arith.constant 0 : i32
    %c0_i32_0 = arith.constant 0 : i32
    %c0_i32_1 = arith.constant 0 : i32
    return %c0_i32, %arg0, %c0_i32_0 : i32, i32, i32
  }
}

</mosaic_0001>

<bundles_post_ra>
// kernel: base_stream_forward.1
= control target key start
LH: loop header
LB: loop body
LE: loop exit
PB: predicated region body
PF: predicated region fallthrough
CT: control target
= control target key end

     0   :  { %s1140_s21 = smov 0   ;;  %s1142_s22 = smov 0   ;;  %s1275_s0 = inlined_call_operand.vmem [shape: f32[2,4,16,256], index: 0, kind: input, shape index: {}]   ;;  %s1276_s1 = inlined_call_operand.vmem [shape: bf16[4,128], index: 1, kind: input, shape index: {}]   ;;  %s1277_s2 = inlined_call_operand.vmem [shape: f32[1,128], index: 2, kind: input, shape index: {}]   ;;  %s1278_s3 = inlined_call_operand.vmem [shape: bf16[128,128], index: 3, kind: input, shape index: {}]   ;;  %s1279_s4 = inlined_call_operand.vmem [shape: f32[1,128], index: 4, kind: input, shape index: {}]   ;;  %s1280_s5 = inlined_call_operand.vmem [shape: f32[2,16,128], index: 5, kind: output, shape index: {0}]   ;;  %s1281_s6 = inlined_call_operand.vmem [shape: f32[2,16,128], index: 6, kind: output, shape index: {1}]  }
   0x1   :  { %s1144_s23 = smov 0  }
   0x2 LB: > { %s1156_s24 = sadd.s32 4294967295, %s1101_s23   ;;  %s1159_s25 = sadd.s32 1, %s1101_s23   ;;  %s1101_s23 = sphi %s1144_s23, %s1285_s23   ;;  %s1097_s22 = sphi %s1142_s22, %s1284_s22   ;;  %s1093_s21 = sphi %s1140_s21, %s1283_s21  }
   0x3   : > { %s21_s26 = ssub.s32 %s1101_s23, %s1159_s25  ;;  %s24_s27 = sadd.s32 1, %s1097_s22 }
   0x4   : > { %p22_p0 = scmp.eq.s32.totalorder %s21_s26, 0  ;;  %p31_p1 = scmp.ne.s32.totalorder %s1097_s22, %s1093_s21 }
   0x5   : > { %p32_p2 = scmp.eq.s32.totalorder %s1101_s23, 0  ;;  %p145_p3 = scmp.eq.s32.totalorder %s1156_s24, 1 }
   0x6   : > { %s1169_s28 = scalar_select %p22_p0, %s1097_s22, %s24_s27  }
   0x7   : > { %p33_p4 = por %p32_p2, %p31_p1  ;;  %p1171_p5 = por %p145_p3, %p31_p1 }
   0x8   : > { %p929_p6 = scmp.ge.s32.totalorder %s1101_s23, 2 }
   0xa   : > { %205 = sbr.rel (%p929_p6) target bundleno = 29 (0x1d), region = 32 }
  0x11   : > { %208 = sbr.rel (!%p33_p4) target bundleno = 29 (0x1d), region = 36  ;;  %s210_s30 = sand.u32 (%p33_p4), 1, %s1097_s22  }
  0x12   : > { %s955_s7 = sshll.u32 (%p33_p4), %s1101_s23, 4  ;;  %s930_s8 = sshll.u32 (%p33_p4), %s210_s30, 7 }
  0x13   : > { %s1181_s11 = scalar_lea.vmem (%p33_p4), %s1275_s0, %s955_s7  ;;  %s212_s12 = scalar_lea.vmem (%p33_p4), [#allocation2], %s930_s8 }
  0x14   : > { %v228_v0 = vld [vmem:[%s1181_s11] sm:$0xff] (%p33_p4)  ;;  %v230_v1 = vld [vmem:[%s1181_s11 + $0x8] sm:$0xff] (%p33_p4) }
  0x15   : > { %v232_v2 = vld [vmem:[%s1181_s11 + $0x20] sm:$0xff] (%p33_p4)  ;;  %229 = vst [vmem:[%s212_s12] sm:$0xff] (%p33_p4), %v228_v0  ;;  %231 = vst [vmem:[%s212_s12 + $0x8] sm:$0xff] (%p33_p4), %v230_v1  ;;  %v234_v3 = vld [vmem:[%s1181_s11 + $0x28] sm:$0xff] (%p33_p4) }
  0x16   : > { %233 = vst [vmem:[%s212_s12 + $0x10] sm:$0xff] (%p33_p4), %v232_v2  ;;  %v236_v4 = vld [vmem:[%s1181_s11 + $0x40] sm:$0xff] (%p33_p4)  ;;  %v238_v5 = vld [vmem:[%s1181_s11 + $0x48] sm:$0xff] (%p33_p4)  ;;  %235 = vst [vmem:[%s212_s12 + $0x18] sm:$0xff] (%p33_p4), %v234_v3 }
  0x17   : > { %237 = vst [vmem:[%s212_s12 + $0x20] sm:$0xff] (%p33_p4), %v236_v4  ;;  %239 = vst [vmem:[%s212_s12 + $0x28] sm:$0xff] (%p33_p4), %v238_v5  ;;  %v240_v6 = vld [vmem:[%s1181_s11 + $0x60] sm:$0xff] (%p33_p4)  ;;  %v242_v7 = vld [vmem:[%s1181_s11 + $0x68] sm:$0xff] (%p33_p4) }
  0x18   : > { %v244_v8 = vld [vmem:[%s1181_s11 + $0x80] sm:$0xff]  ;;  %241 = vst [vmem:[%s212_s12 + $0x30] sm:$0xff] %v240_v6  ;;  %243 = vst [vmem:[%s212_s12 + $0x38] sm:$0xff] %v242_v7  ;;  %v246_v9 = vld [vmem:[%s1181_s11 + $0x88] sm:$0xff] }
  0x19   : > { %245 = vst [vmem:[%s212_s12 + $0x40] sm:$0xff] %v244_v8  ;;  %v248_v10 = vld [vmem:[%s1181_s11 + $0xa0] sm:$0xff]  ;;  %v250_v11 = vld [vmem:[%s1181_s11 + $0xa8] sm:$0xff]  ;;  %247 = vst [vmem:[%s212_s12 + $0x48] sm:$0xff] %v246_v9 }
  0x1a   : > { %249 = vst [vmem:[%s212_s12 + $0x50] sm:$0xff] %v248_v10  ;;  %251 = vst [vmem:[%s212_s12 + $0x58] sm:$0xff] %v250_v11  ;;  %v252_v12 = vld [vmem:[%s1181_s11 + $0xc0] sm:$0xff]  ;;  %v254_v13 = vld [vmem:[%s1181_s11 + $0xc8] sm:$0xff] }
  0x1b   : > { %v256_v14 = vld [vmem:[%s1181_s11 + $0xe0] sm:$0xff]  ;;  %253 = vst [vmem:[%s212_s12 + $0x60] sm:$0xff] %v252_v12  ;;  %255 = vst [vmem:[%s212_s12 + $0x68] sm:$0xff] %v254_v13  ;;  %v258_v15 = vld [vmem:[%s1181_s11 + $0xe8] sm:$0xff] }
  0x1c   : > { %257 = vst [vmem:[%s212_s12 + $0x70] sm:$0xff] %v256_v14  ;;  %259 = vst [vmem:[%s212_s12 + $0x78] sm:$0xff] %v258_v15 }
  0x1d PF: > { %p933_p7 = scmp.ge.s32.totalorder %s1101_s23, 1  ;;  %p264_p8 = scmp.lt.s32.totalorder %s1101_s23, 3 }
  0x1f   : > { %p265_p9 = pnand %p933_p7, %p264_p8 }
  0x20   : > { %s271_s13 = sand.u32 (!%p265_p9), 1, %s1093_s21   ;;  %v361_v41 = vlaneseq (!%p265_p9)  ;;  %vm395_vm0 = vcmask (!%p265_p9), 1041409   ;;  %vm397_vm1 = vcmask (!%p265_p9), 1042434   ;;  %vm399_vm2 = vcmask (!%p265_p9), 1043459   ;;  %v472_v11 = vld [vmem:[%s1276_s1] sm:$0x3] (!%p265_p9) }
  0x21   : > { %268 = sbr.rel (%p265_p9) target bundleno = 1094 (0x446), region = 59  ;;  %s934_s14 = sshll.u32 (!%p265_p9), %s271_s13, 7  ;;  %vm484_vm3 = vcmask (!%p265_p9), 1041408   ;;  %v1103_v12 = vmov (!%p265_p9), 0.0   ;;  %vm1104_vm4 = vmmov (!%p265_p9), 0   ;;  %vm480_vm5 = vcmask (!%p265_p9), 31744  }
  0x22   : > { %s273_s15 = scalar_lea.vmem (!%p265_p9), [#allocation2], %s934_s14  ;;  %v362_v44 = vand.u32 (!%p265_p9), 127, %v361_v41  ;;  %v364_v45 = vshrl.u32 (!%p265_p9), %v361_v41, 7  ;;  %978 = vmatprep.subr.bf16.mxu0 (!%p265_p9), %v1103_v12  ;;  %984 = vmatprep.subr.bf16.mxu1 (!%p265_p9), %v1103_v12  ;;  %v486_v13 = vsel (!%p265_p9), %vm484_vm3, %v472_v11, 0  ;;  %s1240_s19 = sshll.u32 (!%p265_p9), %s271_s13, 4 }
  0x23   : > { %v312_v16 = vld [vmem:[%s273_s15 + $0x40] sm:$0xff] (!%p265_p9)  ;;  %v313_v17 = vld [vmem:[%s273_s15 + $0x48] sm:$0xff] (!%p265_p9)  ;;  %v314_v21 = vld [vmem:[%s273_s15 + $0x50] sm:$0xff] (!%p265_p9)  ;;  %979 = vmatpush3.bf16.msra.mxu0 (!%p265_p9), %v486_v13  ;;  %985 = vmatpush3.bf16.msra.mxu1 (!%p265_p9), %v486_v13  ;;  %s1243_s20 = scalar_lea.vmem (!%p265_p9), [#allocation3], %s1240_s19  ;;  %s302_s23 = scalar_lea.vmem (!%p265_p9), [#allocation4], %s1240_s19 }
  0x24   : > { %v304_v18 = vld [vmem:[%s273_s15] sm:$0xff] (!%p265_p9)  ;;  %v332_v19 = vadd.f32 (!%p265_p9), %v313_v17, %v312_v16  ;;  %v305_v20 = vld [vmem:[%s273_s15 + $0x8] sm:$0xff] (!%p265_p9)  ;;  %v315_v22 = vld [vmem:[%s273_s15 + $0x58] sm:$0xff] (!%p265_p9)  ;;  %v365_v50 = vsub.s32 (!%p265_p9), %v362_v44, %v364_v45  ;;  %990 = vmatprep.subr.bf16.mxu0 (!%p265_p9), %v1103_v12  ;;  %1010 = vmatprep.subr.bf16.mxu1 (!%p265_p9), %v1103_v12 }
  0x25   : > { %v320_v23 = vadd.f32 (!%p265_p9), %v305_v20, %v304_v18  ;;  %v306_v24 = vld [vmem:[%s273_s15 + $0x10] sm:$0xff] (!%p265_p9)  ;;  %v307_v25 = vld [vmem:[%s273_s15 + $0x18] sm:$0xff] (!%p265_p9)  ;;  %v335_v26 = vadd.f32 (!%p265_p9), %v315_v22, %v314_v21  ;;  %v316_v28 = vld [vmem:[%s273_s15 + $0x60] sm:$0xff] (!%p265_p9)  ;;  %980 = vmatprep.mubr.msk.bf16.mxu0 (!%p265_p9), %vm1104_vm4, %v1103_v12  ;;  %986 = vmatprep.mubr.msk.bf16.mxu1 (!%p265_p9), %vm1104_vm4, %v1103_v12 }
  0x26   : > { %333 = vadd.xlane.f32.xlu1 (!%p265_p9), %v332_v19  ;;  %v323_v27 = vadd.f32 (!%p265_p9), %v307_v25, %v306_v24  ;;  %v317_v29 = vld [vmem:[%s273_s15 + $0x68] sm:$0xff] (!%p265_p9)  ;;  %v308_v30 = vld [vmem:[%s273_s15 + $0x20] sm:$0xff] (!%p265_p9)  ;;  %v318_v32 = vld [vmem:[%s273_s15 + $0x70] sm:$0xff] (!%p265_p9) }
  0x27   : > { %321 = vadd.xlane.f32.xlu0 (!%p265_p9), %v320_v23  ;;  %v309_v31 = vld [vmem:[%s273_s15 + $0x28] sm:$0xff] (!%p265_p9)  ;;  %v319_v33 = vld [vmem:[%s273_s15 + $0x78] sm:$0xff] (!%p265_p9)  ;;  %v338_v34 = vadd.f32 (!%p265_p9), %v317_v29, %v316_v28  ;;  %v310_v36 = vld [vmem:[%s273_s15 + $0x30] sm:$0xff] (!%p265_p9) }
  0x28   : > { %v326_v35 = vadd.f32 %v309_v31, %v308_v30  ;;  %v311_v37 = vld [vmem:[%s273_s15 + $0x38] sm:$0xff]  ;;  %v341_v38 = vadd.f32 %v319_v33, %v318_v32  ;;  %v1063_v17 = vld [vmem:[%s1278_s3] sm:$0xff]   ;;  %v1064_v20 = vld [vmem:[%s1278_s3 + $0x8] sm:$0xff]   ;;  %s951_s26 = sshll.u32 (%p1171_p5), %s1156_s24, 3 }
  0x29   : > { %v329_v39 = vadd.f32 %v311_v37, %v310_v36  ;;  %v1065_v21 = vld [vmem:[%s1278_s3 + $0x10] sm:$0xff]   ;;  %v1066_v22 = vld [vmem:[%s1278_s3 + $0x18] sm:$0xff]   ;;  %v1067_v23 = vld [vmem:[%s1278_s3 + $0x20] sm:$0xff]   ;;  %s764_s7 = scalar_lea.vmem (%p1171_p5), %s1280_s5, %s951_s26 }
  0x2a   : > { %336 = vadd.xlane.f32.xlu1 %v335_v26  ;;  %v1068_v24 = vld [vmem:[%s1278_s3 + $0x28] sm:$0xff]   ;;  %v1069_v25 = vld [vmem:[%s1278_s3 + $0x30] sm:$0xff]   ;;  %v1070_v26 = vld [vmem:[%s1278_s3 + $0x38] sm:$0xff]  }
  0x2b   : > { %324 = vadd.xlane.f32.xlu0 %v323_v27  ;;  %v937_v27 = vld [vmem:[%s1277_s2] ss:$0 sm:$0xff] }
  0x2e   : > { %339 = vadd.xlane.f32.xlu1 %v338_v34 }
  0x2f   : > { %327 = vadd.xlane.f32.xlu0 %v326_v35 }
  0x32   : > { %342 = vadd.xlane.f32.xlu1 %v341_v38 }
  0x33   : > { %330 = vadd.xlane.f32.xlu0 %v329_v39 }
  0xb3   : > { %v334_v40 = vpop.xlane.xlu1 %333 }
  0xb4   : > { %v322_v42 = vpop.xlane.xlu0 %321  ;;  %v349_v51 = vmul.f32 0.00390625, %v334_v40 }
  0xb5   : > { %v345_v54 = vmul.f32 0.00390625, %v322_v42  ;;  %v940_v42 = vld [vmem:[%s1279_s4] ss:$0 sm:$0xff] }
  0xb6   : > { %v382_v60 = vrot.slane %v349_v51, %v365_v50 }
  0xb7   : > { %v337_v43 = vpop.xlane.xlu1 %336  ;;  %v366_v0 = vrot.slane %v345_v54, %v365_v50 }
  0xb8   : > { %v325_v46 = vpop.xlane.xlu0 %324  ;;  %v350_v47 = vmul.f32 0.00390625, %v337_v43 }
  0xb9   : > { %v346_v48 = vmul.f32 0.00390625, %v325_v46 }
  0xba   : > { %v386_v56 = vrot.slane %v350_v47, %v365_v50 }
  0xbb   : > { %v340_v49 = vpop.xlane.xlu1 %339  ;;  %v370_v57 = vrot.slane %v346_v48, %v365_v50 }
  0xbc   : > { %v351_v52 = vmul.f32 0.00390625, %v340_v49  ;;  %v328_v53 = vpop.xlane.xlu0 %327  ;;  %v401_v3 = vsel %vm395_vm0, %v386_v56, %v382_v60 }
  0xbd   : > { %v347_v55 = vmul.f32 0.00390625, %v328_v53  ;;  %v396_v5 = vsel %vm395_vm0, %v370_v57, %v366_v0 }
  0xbe   : > { %v390_v58 = vrot.slane %v351_v52, %v365_v50 }
  0xbf   : > { %v343_v59 = vpop.xlane.xlu1 %342  ;;  %v374_v61 = vrot.slane %v347_v55, %v365_v50 }
  0xc0   : > { %v352_v62 = vmul.f32 0.00390625, %v343_v59  ;;  %v331_v63 = vpop.xlane.xlu0 %330  ;;  %v402_v6 = vsel %vm397_vm1, %v390_v58, %v401_v3 }
  0xc1   : > { %v348_v1 = vmul.f32 0.00390625, %v331_v63  ;;  %v398_v7 = vsel %vm397_vm1, %v374_v61, %v396_v5 }
  0xc2   : > { %v394_v2 = vrot.slane %v352_v62, %v365_v50 }
  0xc3   : > { %v378_v4 = vrot.slane %v348_v1, %v365_v50 }
  0xc4   : > { %v403_v8 = vsel %vm399_vm2, %v394_v2, %v402_v6 }
  0xc5   : > { %v400_v9 = vsel %vm399_vm2, %v378_v4, %v398_v7 }
  0xc6   : > { %v1056_v10 = vpack.i.bf16 %v403_v8, %v400_v9 }
  0xc8   : > { %1057 = vxpose.xlu0.b32.start.end [1/1] (short) (narrow) %v1056_v10, 8 }
 0x148   : > { %v1058_v14 = vpop.trf.xlu0 }
 0x149   : > { %v1062_v15 = vunpack.i.h.bf16 %v1058_v14  ;;  %v1059_v16 = vunpack.i.l.bf16 %v1058_v14 }
 0x14b   : > { %v471_v18 = vpack.c.bf16 %v1062_v15, %v1062_v15  ;;  %v470_v19 = vpack.c.bf16 %v1059_v16, %v1059_v16 }
 0x14d   : > { %981 = vmatmul.mubr.msk.bf16.vlgmr.msra.gmra.mrb[0].mxu0 %vm480_vm5, %v470_v19  ;;  %987 = vmatmul.mubr.msk.bf16.vlgmr.msra.gmra.mrb[0].mxu1 %vm480_vm5, %v471_v18 }
 0x14e   : > { %991 = vmatpush3.bf16.msra.mxu0 %v1063_v17  ;;  %1011 = vmatpush3.bf16.msra.mxu1 %v1063_v17 }
 0x14f   : > { %992 = vmatprep.subr.bf16.mxu0 %v1103_v12  ;;  %1012 = vmatprep.subr.bf16.mxu1 %v1103_v12 }
 0x150   : > { %1006 = vmatprep.mubr.msk.bf16.mxu0 %vm1104_vm4, %v1103_v12  ;;  %1026 = vmatprep.mubr.msk.bf16.mxu1 %vm1104_vm4, %v1103_v12 }
 0x152   : > { %993 = vmatpush3.bf16.msra.mxu0 %v1064_v20  ;;  %1013 = vmatpush3.bf16.msra.mxu1 %v1064_v20 }
 0x153   : > { %994 = vmatprep.subr.bf16.mxu0 %v1103_v12  ;;  %1014 = vmatprep.subr.bf16.mxu1 %v1103_v12 }
 0x156   : > { %995 = vmatpush3.bf16.msra.mxu0 %v1065_v21  ;;  %1015 = vmatpush3.bf16.msra.mxu1 %v1065_v21 }
 0x157   : > { %996 = vmatprep.subr.bf16.mxu0 %v1103_v12  ;;  %1016 = vmatprep.subr.bf16.mxu1 %v1103_v12 }
 0x15a   : > { %997 = vmatpush3.bf16.msra.mxu0 %v1066_v22  ;;  %1017 = vmatpush3.bf16.msra.mxu1 %v1066_v22 }
 0x15b   : > { %998 = vmatprep.subr.bf16.mxu0 %v1103_v12  ;;  %1018 = vmatprep.subr.bf16.mxu1 %v1103_v12 }
 0x15e   : > { %999 = vmatpush3.bf16.msra.mxu0 %v1067_v23  ;;  %1019 = vmatpush3.bf16.msra.mxu1 %v1067_v23 }
 0x15f   : > { %1000 = vmatprep.subr.bf16.mxu0 %v1103_v12  ;;  %1020 = vmatprep.subr.bf16.mxu1 %v1103_v12 }
 0x162   : > { %1001 = vmatpush3.bf16.msra.mxu0 %v1068_v24  ;;  %1021 = vmatpush3.bf16.msra.mxu1 %v1068_v24 }
 0x163   : > { %1002 = vmatprep.subr.bf16.mxu0 %v1103_v12  ;;  %1022 = vmatprep.subr.bf16.mxu1 %v1103_v12 }
 0x166   : > { %1003 = vmatpush3.bf16.msra.mxu0 %v1069_v25  ;;  %1023 = vmatpush3.bf16.msra.mxu1 %v1069_v25 }
 0x167   : > { %1004 = vmatprep.subr.bf16.mxu0 %v1103_v12  ;;  %1024 = vmatprep.subr.bf16.mxu1 %v1103_v12 }
 0x16a   : > { %1005 = vmatpush3.bf16.msra.mxu0 %v1070_v26  ;;  %1025 = vmatpush3.bf16.msra.mxu1 %v1070_v26 }
 0x220   : > { %v522_v28 = vpop.f32.mrb[0].mxu0  ;;  %v565_v29 = vpop.f32.mrb[0].mxu1 }
 0x221   : > { %v523_v30 = vadd.f32 %v937_v27, %v522_v28  ;;  %v566_v31 = vadd.f32 %v937_v27, %v565_v29  ;;  %v982_v32 = vpop.f32.mrb[1].mxu0  ;;  %v988_v33 = vpop.f32.mrb[1].mxu1 }
 0x222   : > { %v525_v34 = vpop.f32.mrb[2].mxu0  ;;  %v568_v35 = vpop.f32.mrb[2].mxu1 }
 0x223   : > { %v571_v36 = vmax.f32 %v523_v30, 0.0  ;;  %v572_v37 = vmax.f32 %v566_v31, 0.0  ;;  %v983_v38 = vpop.f32.mrb[3].mxu0  ;;  %v989_v39 = vpop.f32.mrb[3].mxu1 }
 0x225   : > { %573 = vst [vmem:[%s1243_s20] sm:$0xff] %v571_v36  ;;  %v591_v40 = vpack.c.bf16 %v571_v36, %v571_v36  ;;  %574 = vst [vmem:[%s1243_s20 + $0x8] sm:$0xff] %v572_v37  ;;  %v592_v41 = vpack.c.bf16 %v572_v37, %v572_v37 }
 0x227   : > { %1007 = vmatmul.mubr.bf16.vlgmr.msra.gmra.mrb[4].mxu0 %v591_v40  ;;  %1027 = vmatmul.mubr.bf16.vlgmr.msra.gmra.mrb[4].mxu1 %v592_v41 }
 0x22c   : > { %v794_v7 = vld [vmem:[%s1243_s20] sm:$0xff] (%p1171_p5)  ;;  %v796_v8 = vld [vmem:[%s1243_s20 + $0x8] sm:$0xff] (%p1171_p5) }
 0x22d   : > { %795 = vst [vmem:[%s764_s7] sm:$0xff] (%p1171_p5), %v794_v7  ;;  %797 = vst [vmem:[%s764_s7 + $0x10] sm:$0xff] (%p1171_p5), %v796_v8 }
 0x2fa   : > { %v682_v43 = vpop.f32.mrb[4].mxu0  ;;  %v722_v44 = vpop.f32.mrb[4].mxu1 }
 0x2fb   : > { %v683_v45 = vadd.f32 %v940_v42, %v682_v43  ;;  %v1008_v46 = vpop.f32.mrb[5].mxu0  ;;  %v1028_v47 = vpop.f32.mrb[5].mxu1  ;;  %v723_v52 = vadd.f32 %v940_v42, %v722_v44 }
 0x2fc   : > { %v685_v48 = vpop.f32.mrb[6].mxu0  ;;  %v725_v49 = vpop.f32.mrb[6].mxu1 }
 0x2fd   : > { %v1029_v50 = vpop.f32.mrb[7].mxu1  ;;  %728 = vmax.xlane.f32.xlu1 %v683_v45  ;;  %v1009_v51 = vpop.f32.mrb[7].mxu0 }
 0x301   : > { %730 = vmax.xlane.f32.xlu1 %v723_v52 }
 0x38a   : > { %v729_v53 = vpop.xlane.xlu1 %728 }
 0x38b   : > { %v732_v54 = vsub.f32 %v683_v45, %v729_v53 }
 0x38d   : > { %v734_v55 = vmul.f32 1.442695, %v732_v54 }
 0x38e   : > { %v731_v56 = vpop.xlane.xlu1 %730 }
 0x38f   : > { %1071 = vpow2.f32 %v734_v55  ;;  %v733_v57 = vsub.f32 %v723_v52, %v731_v56 }
 0x391   : > { %v736_v58 = vmul.f32 1.442695, %v733_v57 }
 0x393   : > { %1073 = vpow2.f32 %v736_v58 }
 0x399   : > { %v1072_v59 = vpop.eup %1071 }
 0x39a   : > { %738 = vadd.xlane.f32.xlu1 %v1072_v59 }
 0x39d   : > { %v1074_v60 = vpop.eup %1073 }
 0x39e   : > { %740 = vadd.xlane.f32.xlu1 %v1074_v60 }
 0x427   : > { %v739_v61 = vpop.xlane.xlu1 %738 }
 0x428   : > { %1075 = vlog2.f32 %v739_v61 }
 0x42b   : > { %v741_v62 = vpop.xlane.xlu1 %740 }
 0x42c   : > { %1077 = vlog2.f32 %v741_v62 }
 0x432   : > { %v1076_v63 = vpop.eup %1075 }
 0x433   : > { %v743_v0 = vmul.f32 0.6931472, %v1076_v63 }
 0x435   : > { %v746_v1 = vadd.f32 %v743_v0, %v729_v53 }
 0x436   : > { %v1078_v2 = vpop.eup %1077 }
 0x437   : > { %v748_v3 = vsub.f32 %v683_v45, %v746_v1  ;;  %v745_v4 = vmul.f32 0.6931472, %v1078_v2  ;;  %762 = sbr.rel (!%p1171_p5) target bundleno = 1086 (0x43e), region = 67 }
 0x439   : > { %750 = vst [vmem:[%s302_s23] sm:$0xff] %v748_v3  ;;  %v747_v5 = vadd.f32 %v745_v4, %v731_v56 }
 0x43b   : > { %v749_v6 = vsub.f32 %v723_v52, %v747_v5 }
 0x43d   : > { %751 = vst [vmem:[%s302_s23 + $0x8] sm:$0xff] %v749_v6 }
 0x43e PF: > { %803 = sbr.rel (!%p1171_p5) target bundleno = 1094 (0x446), region = 105  ;;  %s952_s8 = sshll.u32 (%p1171_p5), %s1156_s24, 3 }
 0x43f   : > { %s805_s11 = scalar_lea.vmem (%p1171_p5), %s1281_s6, %s952_s8 }
 0x440   : > { %v835_v9 = vld [vmem:[%s302_s23] sm:$0xff] (%p1171_p5) }
 0x441   : > { %836 = vst [vmem:[%s805_s11] sm:$0xff] (%p1171_p5), %v835_v9 }
 0x444   : > { %v837_v10 = vld [vmem:[%s302_s23 + $0x8] sm:$0xff] (%p1171_p5) }
 0x445   : > { %838 = vst [vmem:[%s805_s11 + $0x10] sm:$0xff] %v837_v10 }
 0x446 PF: > { %p14_p10 = scmp.ge.s32.totalorder %s1159_s25, 4   ;;  %s1283_s21 = smov %s1097_s22 }
 0x447   : > { %s1284_s22 = smov %s1169_s28  ;;  %s1285_s23 = smov %s1159_s25 }
 0x448   :  { %16 = sbr.rel (!%p14_p10) target bundleno = 2 (0x2), region = 186 }

</bundles_post_ra>
